<compile_context>
chip_gen: v5e
topology: v5e:2x2
jax: 0.10.0
libtpu: 0.0.40
codegen_flags: <defaults>
</compile_context>

<pallas_src>
import jax
import jax.numpy as jnp
from jax.experimental import pallas as pl
from jax.experimental.pallas import tpu as pltpu


def _return_exit_value_kernel(exit_ref, o_ref):
    # Forward pass: output <- exit_value (the module never reads x).
    o_ref[...] = exit_ref[...]


def mock_classifier_forward(x: jax.Array, exit_value: jax.Array) -> jax.Array:
    """MockClassifier.forward: returns exit_value, ignores x.

    Structural optimization (perf review, highest value): no pallas_call at
    all -- the op is a pure pass-through, so returning the array lets XLA
    elide it completely.
    """
    del x  # MockClassifier.forward never reads x.
    return exit_value


def mock_classifier_forward_pallas(x: jax.Array, exit_value: jax.Array) -> jax.Array:
    """Explicit Pallas-kernel variant (kept for a kernel-API contract).

    Gridless whole-array VMEM blocks; the output aliases the input buffer so
    the call collapses to launch overhead plus one vreg load/store.
    """
    del x  # MockClassifier.forward never reads x.
    return pl.pallas_call(
        _return_exit_value_kernel,
        out_shape=jax.ShapeDtypeStruct(exit_value.shape, exit_value.dtype),
        in_specs=[pl.BlockSpec(memory_space=pltpu.VMEM)],
        out_specs=pl.BlockSpec(memory_space=pltpu.VMEM),
        input_output_aliases={0: 0},
    )(exit_value)


if __name__ == "__main__":
    key = jax.random.PRNGKey(0)
    k_x, k_exit = jax.random.split(key)

    # Small shapes consistent with a classifier module:
    #   x:          (batch=2, channels=4, H=16, W=16)  -- ignored by forward
    #   exit_value: (batch=2, num_classes=8)           -- returned verbatim
    x = jax.random.normal(k_x, (2, 4, 16, 16), dtype=jnp.float32)
    exit_value = jax.random.normal(k_exit, (2, 8), dtype=jnp.float32)

    # Independent reference copy (input_output_aliases={0: 0} may donate
    # exit_value's buffer to the Pallas output, so don't read it afterwards).
    expected = jax.block_until_ready(exit_value + 0.0)

    # Fast path (recommended): no kernel at all. Check before the Pallas call.
    out_fast = mock_classifier_forward(x, exit_value)
    assert out_fast.shape == expected.shape
    assert out_fast.dtype == expected.dtype
    assert bool(jnp.all(out_fast == expected))

    # Explicit Pallas kernel path.
    out_pallas = mock_classifier_forward_pallas(x, exit_value)
    out_pallas = jax.block_until_ready(out_pallas)
    assert out_pallas.shape == expected.shape
    assert out_pallas.dtype == expected.dtype
    assert bool(jnp.all(out_pallas == expected))

    print("KERNEL_OK")
</pallas_src>

<mosaic_0001>
module attributes {stable_mosaic.version = 11 : i64} {
  func.func @_return_exit_value_kernel(%arg0: memref<2x8xf32, #tpu.memory_space<vmem>>, %arg1: memref<2x8xf32, #tpu.memory_space<vmem>>) attributes {dimension_semantics = [], scalar_prefetch = 0 : i64, scratch_operands = 0 : i64, tpu.core_type = #tpu.core_type<tc>} {
    %c0 = arith.constant 0 : index
    %c0_0 = arith.constant 0 : index
    %0 = vector.load %arg0[%c0, %c0_0] : memref<2x8xf32, #tpu.memory_space<vmem>>, vector<2x8xf32>
    %c0_1 = arith.constant 0 : index
    %c0_2 = arith.constant 0 : index
    %1 = vector.load %arg1[%c0_1, %c0_2] : memref<2x8xf32, #tpu.memory_space<vmem>>, vector<2x8xf32>
    tpu.vector_store %arg1[%c0_1, %c0_2], %0 {strides = array<i32>} : memref<2x8xf32, #tpu.memory_space<vmem>>, vector<2x8xf32>,
    return
  }
}

</mosaic_0001>

<bundles_post_ra>
// kernel: tpu_custom_call.1
= control target key start
LH: loop header
LB: loop body
LE: loop exit
PB: predicated region body
PF: predicated region fallthrough
CT: control target
= control target key end

     0   :  { %6 = vsyncpa [#allocation3], 0  ;;  %s115_s0 = inlined_call_operand.hbm [shape: f32[2,8], index: 0, kind: input, shape index: {}, may-alias: {0,1}]   ;;  %s116_s1 = inlined_call_operand.hbm [shape: f32[2,8], index: 1, kind: output, shape index: {}, may-alias: {0,1}]  }
   0x1   :  { %7 = vsyncpa [#allocation4], 0  ;;  %s13_s8 = sshll.u32 %s115_s0, 4  ;;  %s97_s9 = smov [#allocation2]   ;;  %s14_s8 = int_to_ptr.hbm [resolvable:$true] %s13_s8 }
   0x2   :  { %s15_s10 = sshll.u32 %s97_s9, 4  ;;  %s16_s10 = int_to_ptr.vmem [resolvable:$true] %s15_s10 }
   0x3   :  { %18 = dma.hbm_to_vmem [thread:$0]  %s14_s8, 32, %s16_s10, [#allocation3]  }
   0x4   :  { %93 = dma.done.wait [#allocation3], 32  }
   0x5   :  { %94 = vsyncadd [#allocation3], 4294967264  ;;  %s98_s11 = smov [#allocation5]   ;;  %s33_s15 = sshll.u32 %s116_s1, 4  ;;  %vm24_vm0 = vcmask 58368   ;;  %s34_s15 = int_to_ptr.hbm [resolvable:$true] %s33_s15 }
   0x6   :  { %s31_s12 = sshll.u32 %s98_s11, 4  ;;  %v23_v0 = vld [vmem:[#allocation2] sm:$0x3]  ;;  %s32_s12 = int_to_ptr.vmem [resolvable:$true] %s31_s12 }
   0x7   :  { %25 = vst.msk [vmem:[#allocation5] sm:$0x3] %vm24_vm0, %v23_v0 }
   0x8   :  { %36 = dma.vmem_to_hbm [thread:$0]  %s32_s12, 32, %s34_s15, [#allocation4]  }
   0x9   :  { %95 = dma.done.wait [#allocation4], 32  }
   0xa   :  { %96 = vsyncadd [#allocation4], 4294967264 }
   0xb   :  { %41 = vsyncpa [#allocation3], 1 }
   0xc   :  { %42 = vsyncpa [#allocation4], 1 }

</bundles_post_ra>
